<compile_context>
chip_gen: v6e
topology: v6e:2x2x1
jax: 0.10.0
libtpu: 0.0.40
codegen_flags: <defaults>
</compile_context>

<pallas_src>
import functools

import jax
import jax.numpy as jnp
from jax import lax
from jax.experimental import pallas as pl
from jax.experimental.pallas import tpu as pltpu


def _round_up(x, m):
    return ((x + m - 1) // m) * m


def _rbf_features(d_ref, *, gamma, vmin, step, bins):
    """exp(-gamma*(d - c)^2) in the lane-dense (bins, tile_n) orientation.

    N sits on the 128-lane axis so the VPU/EUP work is unpadded (bins=40 on the
    lane axis would waste 128/40 = 3.2x of the exp throughput).  Centers are
    synthesized from an iota — no second input stream, no constant refetch.
    """
    d = d_ref[...]                                                   # (1, tile_n) f32
    idx = lax.broadcasted_iota(jnp.int32, (bins, 1), 0).astype(jnp.float32)
    c = vmin + step * idx                                            # (bins, 1) centers
    s = d - c                                                        # (bins, tile_n)
    # 3 VALU ops + 1 EUP exp per element; EUP / HBM writeback are the binding units.
    return jnp.exp((s * s) * (-gamma))                               # f32, lane-dense


def _rbf_kernel_nb(d_ref, o_ref, **kp):
    # o_ref: (tile_n, bins) block of the (N, bins) output.
    # exp stays lane-dense; the transpose rides the XLU (separate issue slot);
    # the HBM writeback DMA is still fully contiguous because the block spans
    # whole output rows (full bins dim).
    o_ref[...] = jnp.transpose(_rbf_features(d_ref, **kp)).astype(o_ref.dtype)


def _rbf_kernel_bn(d_ref, o_ref, **kp):
    # o_ref: (bins, tile_n) block of the transposed (bins, N) output.
    o_ref[...] = _rbf_features(d_ref, **kp).astype(o_ref.dtype)


def rbf_expansion(distance, *, vmin=0.0, vmax=8.0, bins=40, gamma,
                  tile_n=8192, out_dtype=None, transposed_output=False,
                  fuse_transpose=True):
    """distance: (N,) -> (N, bins), matching RBFExpansion.forward.

    transposed_output=True returns the (bins, N) layout instead (preferred when
    the consumer can absorb it, e.g. via matmul dimension_numbers).
    out_dtype=jnp.bfloat16 halves the dominant HBM writeback; exp math stays f32.
    """
    n = int(distance.shape[0])
    dtype = jnp.dtype(out_dtype) if out_dtype is not None else jnp.dtype(distance.dtype)
    step = (vmax - vmin) / (bins - 1)

    # tile_n: multiple of 128; clamp so the grid has >= 2 steps whenever possible
    # (keeps both v7x TensorCores busy; one extra ~0.35us step on v5e/v6e is noise).
    tile_n = max(128, (int(tile_n) // 128) * 128)
    half = _round_up(max(1, -(-n // 2)), 128)
    tile_n = min(tile_n, max(128, half))
    grid = (pl.cdiv(n, tile_n),)

    # Lane-dense distance row.  Plain reshape: no pad copy, Pallas clips the
    # (possibly partial) last block itself.
    d_row = distance.astype(jnp.float32).reshape(1, n)

    kp = dict(gamma=float(gamma), vmin=float(vmin), step=float(step), bins=int(bins))
    itemsize = dtype.itemsize
    cost = pl.CostEstimate(
        flops=3 * n * bins,
        transcendentals=n * bins,
        bytes_accessed=n * 4 + n * bins * itemsize,
    )
    # Double-buffered out (worst case: (tile_n, bins) blocks are lane-padded to 128
    # in VMEM) + double-buffered in (sublane-padded 1->8) + in-kernel intermediates.
    vmem_bytes = (2 * tile_n * 128 * itemsize
                  + 2 * 8 * tile_n * 4
                  + 6 * bins * tile_n * 4
                  + (2 << 20))
    cparams = pltpu.CompilerParams(
        dimension_semantics=("parallel",),
        vmem_limit_bytes=int(min(max(vmem_bytes, 32 * 1024 * 1024), 56 * 1024 * 1024)),
    )

    def _call_bn():
        # (bins, N) layout: full-width lane-dense stores, no transpose anywhere.
        return pl.pallas_call(
            functools.partial(_rbf_kernel_bn, **kp),
            out_shape=jax.ShapeDtypeStruct((bins, n), dtype),
            grid_spec=pltpu.PrefetchScalarGridSpec(
                num_scalar_prefetch=0,
                grid=grid,
                in_specs=[pl.BlockSpec((1, tile_n), lambda i: (0, i))],
                out_specs=pl.BlockSpec((bins, tile_n), lambda i: (0, i)),
            ),
            compiler_params=cparams,
            cost_estimate=cost,
        )(d_row)

    def _call_nb():
        # (N, bins) layout: exp lane-dense, in-kernel XLU transpose, single writeback.
        return pl.pallas_call(
            functools.partial(_rbf_kernel_nb, **kp),
            out_shape=jax.ShapeDtypeStruct((n, bins), dtype),
            grid_spec=pltpu.PrefetchScalarGridSpec(
                num_scalar_prefetch=0,
                grid=grid,
                in_specs=[pl.BlockSpec((1, tile_n), lambda i: (0, i))],
                out_specs=pl.BlockSpec((tile_n, bins), lambda i: (i, 0)),
            ),
            compiler_params=cparams,
            cost_estimate=cost,
        )(d_row)

    if transposed_output:
        return _call_bn()

    if fuse_transpose:
        try:
            return _call_nb()
        except Exception:
            # Fallback for Mosaic builds without in-kernel 2D transpose support.
            # (Only engages on eager calls; under an outer jit the fast path is used.)
            pass
    # Fallback: lane-dense kernel + wrapper transpose (extra HBM pass).
    return jnp.transpose(_call_bn())


def make_rbf_gamma(vmin=0.0, vmax=8.0, bins=40, lengthscale=None):
    """Replicates the module's __init__: returns (centers, gamma)."""
    centers = jnp.linspace(vmin, vmax, bins, dtype=jnp.float32)
    if lengthscale is None:
        # NOTE: gamma = 1 / mean spacing (NOT squared) — mirrors the original module.
        gamma = 1.0 / float(jnp.mean(jnp.diff(centers)))
    else:
        gamma = 1.0 / (float(lengthscale) ** 2)
    return centers, gamma


if __name__ == "__main__":
    key = jax.random.PRNGKey(0)
    N = 300                      # deliberately NOT a multiple of 128/tile (ragged edge count)
    vmin, vmax, bins = 0.0, 8.0, 40

    distance = jax.random.uniform(key, (N,), dtype=jnp.float32,
                                  minval=0.0, maxval=8.0)
    centers, gamma = make_rbf_gamma(vmin, vmax, bins)

    # Reference in plain JAX (same math as the PyTorch forward).
    ref = jnp.exp(-gamma * (distance[:, None] - centers[None, :]) ** 2)

    # Default path: (N, bins) f32, transpose fused into the kernel.
    out = rbf_expansion(distance, vmin=vmin, vmax=vmax, bins=bins, gamma=gamma)
    out = jax.block_until_ready(out)
    assert out.shape == (N, bins)
    assert out.dtype == distance.dtype
    assert jnp.allclose(out, ref, atol=1e-5, rtol=1e-5)

    # bf16 writeback path (halves the dominant HBM stream; exp stays f32).
    out_bf16 = jax.block_until_ready(
        rbf_expansion(distance, vmin=vmin, vmax=vmax, bins=bins, gamma=gamma,
                      out_dtype=jnp.bfloat16))
    assert out_bf16.shape == (N, bins) and out_bf16.dtype == jnp.bfloat16
    assert jnp.allclose(out_bf16.astype(jnp.float32), ref, atol=1e-2, rtol=1e-2)

    # (bins, N) layout for consumers that can absorb it (no transpose at all).
    out_t = jax.block_until_ready(
        rbf_expansion(distance, vmin=vmin, vmax=vmax, bins=bins, gamma=gamma,
                      transposed_output=True))
    assert out_t.shape == (bins, N)
    assert jnp.allclose(jnp.transpose(out_t), ref, atol=1e-5, rtol=1e-5)

    print("KERNEL_OK")
</pallas_src>

<mosaic_0001>
module attributes {stable_mosaic.version = 11 : i64} {
  func.func @_rbf_kernel_nb(%arg0: i32, %arg1: memref<1x256xf32, #tpu.memory_space<vmem>>, %arg2: memref<256x40xf32, #tpu.memory_space<vmem>>) attributes {dimension_semantics = [#tpu.dimension_semantics<parallel>], iteration_bounds = array<i64: 2>, scalar_prefetch = 0 : i64, scratch_operands = 0 : i64, tpu.core_type = #tpu.core_type<tc>, window_params = [{transform_indices = @transform_0, window_bounds = array<i64: 1, 256>}, {transform_indices = @transform_1, window_bounds = array<i64: 256, 40>}]} {
    %c0 = arith.constant 0 : index
    %c0_0 = arith.constant 0 : index
    %0 = vector.load %arg1[%c0, %c0_0] : memref<1x256xf32, #tpu.memory_space<vmem>>, vector<1x256xf32>
    %1 = tpu.iota {dimensions = array<i32: 0>} : vector<40x1xi32>
    %2 = arith.sitofp %1 : vector<40x1xi32> to vector<40x1xf32>
    %cst = arith.constant 0.205128208 : f32
    %3 = vector.broadcast %cst : f32 to vector<40x1xf32>
    %4 = arith.mulf %3, %2 : vector<40x1xf32>
    %cst_1 = arith.constant 0.000000e+00 : f32
    %5 = vector.broadcast %cst_1 : f32 to vector<40x1xf32>
    %6 = arith.addf %5, %4 : vector<40x1xf32>
    %7 = vector.broadcast %0 : vector<1x256xf32> to vector<40x256xf32>
    %8 = vector.broadcast %6 : vector<40x1xf32> to vector<40x256xf32>
    %9 = arith.subf %7, %8 : vector<40x256xf32>
    %10 = arith.mulf %9, %9 : vector<40x256xf32>
    %cst_2 = arith.constant -4.875000e+00 : f32
    %11 = vector.broadcast %cst_2 : f32 to vector<40x256xf32>
    %12 = arith.mulf %10, %11 : vector<40x256xf32>
    %13 = math.exp %12 : vector<40x256xf32>
    %14 = tpu.transpose %13, [1, 0] : vector<40x256xf32> -> vector<256x40xf32>
    %c0_3 = arith.constant 0 : index
    %c0_4 = arith.constant 0 : index
    %15 = vector.load %arg2[%c0_3, %c0_4] : memref<256x40xf32, #tpu.memory_space<vmem>>, vector<256x40xf32>
    tpu.vector_store %arg2[%c0_3, %c0_4], %14 {strides = array<i32>} : memref<256x40xf32, #tpu.memory_space<vmem>>, vector<256x40xf32>,
    return
  }
  func.func @transform_0(%arg0: i32) -> (i32, i32) {
    %c0_i32 = arith.constant 0 : i32
    %c0_i32_0 = arith.constant 0 : i32
    return %c0_i32, %arg0 : i32, i32
  }
  func.func @transform_1(%arg0: i32) -> (i32, i32) {
    %c0_i32 = arith.constant 0 : i32
    %c0_i32_0 = arith.constant 0 : i32
    return %arg0, %c0_i32 : i32, i32
  }
}

module attributes {stable_mosaic.version = 11 : i64} {
  func.func @_rbf_kernel_bn(%arg0: i32, %arg1: memref<1x256xf32, #tpu.memory_space<vmem>>, %arg2: memref<40x256xf32, #tpu.memory_space<vmem>>) attributes {dimension_semantics = [#tpu.dimension_semantics<parallel>], iteration_bounds = array<i64: 2>, scalar_prefetch = 0 : i64, scratch_operands = 0 : i64, tpu.core_type = #tpu.core_type<tc>, window_params = [{transform_indices = @transform_0, window_bounds = array<i64: 1, 256>}, {transform_indices = @transform_1, window_bounds = array<i64: 40, 256>}]} {
    %c0 = arith.constant 0 : index
    %c0_0 = arith.constant 0 : index
    %0 = vector.load %arg1[%c0, %c0_0] : memref<1x256xf32, #tpu.memory_space<vmem>>, vector<1x256xf32>
    %1 = tpu.iota {dimensions = array<i32: 0>} : vector<40x1xi32>
    %2 = arith.sitofp %1 : vector<40x1xi32> to vector<40x1xf32>
    %cst = arith.constant 0.205128208 : f32
    %3 = vector.broadcast %cst : f32 to vector<40x1xf32>
    %4 = arith.mulf %3, %2 : vector<40x1xf32>
    %cst_1 = arith.constant 0.000000e+00 : f32
    %5 = vector.broadcast %cst_1 : f32 to vector<40x1xf32>
    %6 = arith.addf %5, %4 : vector<40x1xf32>
    %7 = vector.broadcast %0 : vector<1x256xf32> to vector<40x256xf32>
    %8 = vector.broadcast %6 : vector<40x1xf32> to vector<40x256xf32>
    %9 = arith.subf %7, %8 : vector<40x256xf32>
    %10 = arith.mulf %9, %9 : vector<40x256xf32>
    %cst_2 = arith.constant -4.875000e+00 : f32
    %11 = vector.broadcast %cst_2 : f32 to vector<40x256xf32>
    %12 = arith.mulf %10, %11 : vector<40x256xf32>
    %13 = math.exp %12 : vector<40x256xf32>
    %c0_3 = arith.constant 0 : index
    %c0_4 = arith.constant 0 : index
    %14 = vector.load %arg2[%c0_3, %c0_4] : memref<40x256xf32, #tpu.memory_space<vmem>>, vector<40x256xf32>
    tpu.vector_store %arg2[%c0_3, %c0_4], %13 {strides = array<i32>} : memref<40x256xf32, #tpu.memory_space<vmem>>, vector<40x256xf32>,
    return
  }
  func.func @transform_0(%arg0: i32) -> (i32, i32) {
    %c0_i32 = arith.constant 0 : i32
    %c0_i32_0 = arith.constant 0 : i32
    return %c0_i32, %arg0 : i32, i32
  }
  func.func @transform_1(%arg0: i32) -> (i32, i32) {
    %c0_i32 = arith.constant 0 : i32
    %c0_i32_0 = arith.constant 0 : i32
    return %c0_i32, %arg0 : i32, i32
  }
}

</mosaic_0001>

<bundles_post_ra>
// kernel: tpu_custom_call.1
= control target key start
LH: loop header
LB: loop body
LE: loop exit
PB: predicated region body
PF: predicated region fallthrough
CT: control target
= control target key end

     0   :  { %6 = vsyncpa [#allocation3], 0  ;;  %s1256_s0 = inlined_call_operand.hbm [shape: f32[1,300], index: 0, kind: input, shape index: {}]   ;;  %s1257_s1 = inlined_call_operand.vmem [shape: f32[300,40], index: 1, kind: output, shape index: {}]  }
   0x1   :  { %8 = vsyncpa [#allocation3 + $0x1], 0  ;;  %s962_s6 = smov 0   ;;  %s964_s7 = smov 0  }
   0x2   :  { %s966_s8 = smov 0   ;;  %s968_s9 = smov 0  }
   0x3 LB: > { %s981_s10 = sadd.s32 4294967295, %s917_s9   ;;  %s984_s11 = sadd.s32 1, %s917_s9   ;;  %s917_s9 = sphi %s968_s9, %s1269_s9   ;;  %s913_s8 = sphi %s966_s8, %s1268_s8   ;;  %s909_s7 = sphi %s964_s7, %s1267_s7   ;;  %s905_s6 = sphi %s962_s6, %s1266_s6  }
   0x4   : > { %s18_s12 = ssub.s32 %s917_s9, %s984_s11  ;;  %s21_s13 = sadd.s32 1, %s913_s8 }
   0x5   : > { %p19_p0 = scmp.eq.s32.totalorder %s18_s12, 0  ;;  %p28_p1 = scmp.ne.s32.totalorder %s913_s8, %s909_s7 }
   0x6   : > { %p29_p2 = scmp.eq.s32.totalorder %s917_s9, 0  ;;  %p34_p3 = scmp.ne.s32.totalorder %s909_s7, %s905_s6 }
   0x7   : > { %s994_s14 = scalar_select %p19_p0, %s913_s8, %s21_s13  }
   0x8   : > { %p30_p4 = por %p29_p2, %p28_p1  ;;  %p35_p5 = scmp.eq.s32.totalorder %s981_s10, 0 }
   0x9   : > { %p58_p6 = scmp.eq.s32.totalorder %s981_s10, 1  ;;  %p677_p9 = scmp.ge.s32.totalorder %s917_s9, 2 }
   0xa   : > { %p998_p7 = por %p35_p5, %p34_p3 }
   0xb   : > { %p1002_p8 = por %p58_p6, %p28_p1  ;;  %80 = sbr.rel (%p677_p9) target bundleno = 47 (0x2f), region = 16 }
   0xd   : > { %s1259_s16 = scalar_select %p1002_p8, 1, 0 }
  0x10   : > { %83 = sbr.rel (!%p30_p4) target bundleno = 47 (0x2f), region = 20  ;;  %s84_s17 = sand.u32 (%p30_p4), 1, %s913_s8  }
  0x11   : > { %s679_s18 = sshll.u32 (%p30_p4), %s917_s9, 1  ;;  %s678_s19 = sshll.u32 (%p30_p4), %s84_s17, 1 }
  0x12   : > { %s90_s20 = ssub.s32 (%p30_p4), 3, %s679_s18  ;;  %s1012_s23 = scalar_lea.sflag (%p30_p4), [#allocation3], %s84_s17 }
  0x13   : > { %p91_p10 = scmp.lt.s32.totalorder (%p30_p4), %s90_s20, 2  ;;  %s88_s24 = scalar_lea.vmem (%p30_p4), [#allocation2], %s678_s19 }
  0x15   : > { %s1271_s20 = smov (!%p91_p10, %s90_s20), 2 }
  0x16   : > { %s1009_s21 = sshll.u32 %s1271_s20, 4 }
  0x17   : > { %s95_s22 = ssub.s32 32, %s1009_s21 }
  0x18   : > { %96 = vsyncadd %s1012_s23, %s95_s22  ;;  %p681_p11 = scmp.ne.s32.totalorder %s1009_s21, 0  ;;  %s703_s25 = sshll.u32 %s917_s9, 5 }
  0x19   : > { %s99_s28 = scalar_lea.hbm %s1256_s0, %s703_s25  ;;  %s101_s29 = sshll.u32 %s88_s24, 4  ;;  %s102_s29 = int_to_ptr.vmem [resolvable:$true] %s101_s29 }
  0x1a   : > { %s825_s30 = scalar_lea.hbm %s99_s28, %s1009_s21  ;;  %s829_s4 = scalar_lea.hbm %s1256_s0, 48 }
  0x1b   : > { %p826_p12 = scmp.ne.s32.totalorder %s99_s28, %s825_s30  ;;  %p830_p1 = scmp.lt.s32.totalorder %s99_s28, %s1256_s0 }
  0x1c   : > { %p831_p2 = scmp.lt.s32.totalorder %s829_s4, %s825_s30 }
  0x1d   : > { %p827_p13 = pnand %p826_p12, %p681_p11 }
  0x1e   : > { %p832_p3 = por %p831_p2, %p830_p1 }
  0x1f   : > { %p828_p0 = pneg %p827_p13 }
  0x21   : > { %p833_p4 = pnand %p832_p3, %p828_p0 }
  0x23   : > { %836 = shalt.err (!%p833_p4)
}
  0x24   : > { %s837_s12 = scalar_lea.vmem %s102_s29, %s1009_s21  ;;  %s951_s13 = smov [#allocation2]  }
  0x25   : > { %p838_p5 = scmp.ne.s32.totalorder %s102_s29, %s837_s12  ;;  %s841_s17 = sshll.u32 %s951_s13, 4  ;;  %s842_s17 = int_to_ptr.vmem [resolvable:$false] %s841_s17 }
  0x26   : > { %s843_s18 = scalar_lea.vmem %s842_s17, 64  ;;  %p844_p10 = scmp.lt.s32.totalorder %s102_s29, %s842_s17 }
  0x27   : > { %p839_p6 = pnand %p838_p5, %p681_p11  ;;  %p845_p12 = scmp.lt.s32.totalorder %s843_s18, %s837_s12 }
  0x29   : > { %p840_p9 = pneg %p839_p6  ;;  %p846_p13 = por %p845_p12, %p844_p10 }
  0x2b   : > { %p847_p8 = pnand %p846_p13, %p840_p9 }
  0x2d   : > { %850 = shalt.err (!%p847_p8)
}
  0x2e   : > { %104 = dma.hbm_to_vmem [thread:$0]  (%p681_p11), %s99_s28, %s1009_s21, %s102_s29, %s1012_s23  }
  0x2f PF: > { %p683_p0 = scmp.ge.s32.totalorder %s917_s9, 1  ;;  %p106_p1 = scmp.lt.s32.totalorder %s917_s9, 3 }
  0x31   : > { %p107_p2 = pnand %p683_p0, %p106_p1 }
  0x32   : > { %s1039_s19 = sand.u32 (!%p107_p2), 1, %s909_s7  }
  0x33   : > { %110 = sbr.rel (%p107_p2) target bundleno = 322 (0x142), region = 24  ;;  %s684_s20 = sshll.u32 (!%p107_p2), %s1039_s19, 1 }
  0x34   : > { %s113_s22 = scalar_lea.sflag (!%p107_p2), [#allocation3], %s1039_s19  ;;  %s116_s24 = scalar_lea.vmem (!%p107_p2), [#allocation2], %s684_s20 }
  0x38   : > { %900 = dma.done.wait (%p998_p7), %s113_s22, 32  }
  0x39   : > { %902 = vsyncadd (%p998_p7), %s113_s22, 4294967264  ;;  %v145_v0 = vlaneseq  ;;  %v144_v11 = vld [vmem:[%s116_s24] sm:$0x3]  ;;  %s685_s9 = sshll.u32 %s1039_s19, 8  ;;  %vm291_vm0 = vcmask 326656   ;;  %p1260_p7 = scmp.ne.s32.totalorder %s1259_s16, 0 }
  0x3a   : > { %s1048_s15 = scalar_lea.vmem [#allocation4], %s685_s9   ;;  %s687_s21 = sshll.u32 (%p1260_p7), %s981_s10, 5 }
  0x3b   : > { %v146_v1 = vshrl.u32 %v145_v0, 7  ;;  %s704_s23 = sshll.u32 (%p1260_p7), %s981_s10, 8  ;;  %s332_s25 = ssub.s32 (%p1260_p7), 38, %s687_s21 }
  0x3c   : > { %s1121_s28 = scalar_lea.vmem (%p1260_p7), %s1257_s1, %s704_s23   ;;  %p333_p8 = scmp.lt.s32.totalorder (%p1260_p7), %s332_s25, 32 }
  0x3d   : > { %v151_v2 = vcvt.s32.f32 %v146_v1  ;;  %v173_v3 = vsub.s32 1, %v146_v1  ;;  %v169_v4 = vsub.s32 0, %v146_v1  ;;  %v147_v5 = vadd.s32 8, %v146_v1 }
  0x3e   : > { %v148_v6 = vadd.s32 16, %v146_v1  ;;  %v149_v7 = vadd.s32 24, %v146_v1  ;;  %v150_v8 = vadd.s32 32, %v146_v1 }
  0x3f   : > { %v156_v9 = vmul.f32 0.20512821, %v151_v2  ;;  %v152_v10 = vcvt.s32.f32 %v147_v5  ;;  %v174_v15 = vrot.slane %v144_v11, %v173_v3  ;;  %v170_v16 = vrot.slane %v144_v11, %v169_v4 }
  0x40   : > { %v153_v12 = vcvt.s32.f32 %v148_v6  ;;  %v154_v13 = vcvt.s32.f32 %v149_v7  ;;  %v155_v14 = vcvt.s32.f32 %v150_v8 }
  0x41   : > { %v157_v17 = vmul.f32 0.20512821, %v152_v10  ;;  %v178_v20 = vsub.f32 %v174_v15, %v156_v9  ;;  %v177_v21 = vsub.f32 %v170_v16, %v156_v9 }
  0x42   : > { %v158_v18 = vmul.f32 0.20512821, %v153_v12  ;;  %v159_v19 = vmul.f32 0.20512821, %v154_v13  ;;  %v160_v27 = vmul.f32 0.20512821, %v155_v14 }
  0x43   : > { %v180_v22 = vsub.f32 %v174_v15, %v157_v17  ;;  %v179_v23 = vsub.f32 %v170_v16, %v157_v17  ;;  %v188_v28 = vmul.f32 %v178_v20, %v178_v20  ;;  %v187_v29 = vmul.f32 %v177_v21, %v177_v21 }
  0x44   : > { %v182_v24 = vsub.f32 %v174_v15, %v158_v18  ;;  %v181_v25 = vsub.f32 %v170_v16, %v158_v18  ;;  %v184_v26 = vsub.f32 %v174_v15, %v159_v19  ;;  %v183_v34 = vsub.f32 %v170_v16, %v159_v19 }
  0x45   : > { %v190_v30 = vmul.f32 %v180_v22, %v180_v22  ;;  %v189_v31 = vmul.f32 %v179_v23, %v179_v23  ;;  %v198_v35 = vmul.f32 -4.875, %v188_v28  ;;  %v197_v36 = vmul.f32 -4.875, %v187_v29 }
  0x46   : > { %v192_v32 = vmul.f32 %v182_v24, %v182_v24  ;;  %v191_v33 = vmul.f32 %v181_v25, %v181_v25  ;;  %v194_v40 = vmul.f32 %v184_v26, %v184_v26  ;;  %v186_v44 = vsub.f32 %v174_v15, %v160_v27 }
  0x47   : > { %v200_v37 = vmul.f32 -4.875, %v190_v30  ;;  %v199_v38 = vmul.f32 -4.875, %v189_v31  ;;  %v209_v41 = vmul.f32 1.442695, %v198_v35  ;;  %v207_v42 = vmul.f32 1.442695, %v197_v36 }
  0x48   : > { %v202_v39 = vmul.f32 -4.875, %v192_v32  ;;  %v201_v46 = vmul.f32 -4.875, %v191_v33  ;;  %v193_v47 = vmul.f32 %v183_v34, %v183_v34  ;;  %v185_v48 = vsub.f32 %v170_v16, %v160_v27 }
  0x49   : > { %v213_v43 = vmul.f32 1.442695, %v200_v37  ;;  %v211_v45 = vmul.f32 1.442695, %v199_v38  ;;  %805 = vpow2.f32 %v209_v41  ;;  %v204_v50 = vmul.f32 -4.875, %v194_v40 }
  0x4a   : > { %807 = vpow2.f32 %v207_v42  ;;  %v217_v49 = vmul.f32 1.442695, %v202_v39  ;;  %v196_v51 = vmul.f32 %v186_v44, %v186_v44  ;;  %v215_v52 = vmul.f32 1.442695, %v201_v46 }
  0x4b   : > { %809 = vpow2.f32 %v213_v43  ;;  %v203_v53 = vmul.f32 -4.875, %v193_v47  ;;  %v195_v54 = vmul.f32 %v185_v48, %v185_v48  ;;  %v221_v55 = vmul.f32 1.442695, %v204_v50 }
  0x4c   : > { %811 = vpow2.f32 %v211_v45  ;;  %v206_v56 = vmul.f32 -4.875, %v196_v51 }
  0x4d   : > { %813 = vpow2.f32 %v217_v49  ;;  %v219_v57 = vmul.f32 1.442695, %v203_v53  ;;  %v205_v58 = vmul.f32 -4.875, %v195_v54 }
  0x4e   : > { %815 = vpow2.f32 %v215_v52  ;;  %v225_v59 = vmul.f32 1.442695, %v206_v56 }
  0x4f   : > { %817 = vpow2.f32 %v221_v55  ;;  %v223_v60 = vmul.f32 1.442695, %v205_v58 }
  0x50   : > { %819 = vpow2.f32 %v219_v57 }
  0x51   : > { %821 = vpow2.f32 %v225_v59 }
  0x52   : > { %823 = vpow2.f32 %v223_v60 }
  0x56   : > { %v806_v61 = vpop.eup %805 }
  0x57   : > { %v808_v62 = vpop.eup %807  ;;  %259 = vxpose.xlu1.b32.start [1/5] (short) %v806_v61, 128 }
  0x58   : > { %v810_v63 = vpop.eup %809  ;;  %227 = vxpose.xlu0.b32.start [1/5] (short) %v808_v62, 128 }
  0x59   : > { %v812_v0 = vpop.eup %811 }
  0x5a   : > { %v814_v1 = vpop.eup %813 }
  0x5b   : > { %260 = vxpose.xlu1.b32.cont [2/5] (short) %v810_v63, 128  ;;  %v816_v2 = vpop.eup %815 }
  0x5c   : > { %228 = vxpose.xlu0.b32.cont [2/5] (short) %v812_v0, 128  ;;  %v818_v3 = vpop.eup %817 }
  0x5d   : > { %v820_v4 = vpop.eup %819 }
  0x5e   : > { %v822_v5 = vpop.eup %821 }
  0x5f   : > { %261 = vxpose.xlu1.b32.cont [3/5] (short) %v814_v1, 128  ;;  %v824_v6 = vpop.eup %823 }
  0x60   : > { %229 = vxpose.xlu0.b32.cont [3/5] (short) %v816_v2, 128 }
  0x63   : > { %262 = vxpose.xlu1.b32.cont [4/5] (short) %v818_v3, 128 }
  0x64   : > { %230 = vxpose.xlu0.b32.cont [4/5] (short) %v820_v4, 128 }
  0x67   : > { %263 = vxpose.xlu1.b32.end [5/5] (short) %v822_v5, 128 }
  0x68   : > { %231 = vxpose.xlu0.b32.end [5/5] (short) %v824_v6, 128 }
  0xd3   : > { %v275_v7 = vpop.trf.xlu1 }
  0xd4   : > { %308 = vst.msk [vmem:[%s1048_s15 + $0x80] sm:$0xff] %vm291_vm0, %v275_v7  ;;  %v243_v8 = vpop.trf.xlu0 }
  0xd5   : > { %292 = vst.msk [vmem:[%s1048_s15] sm:$0xff] %vm291_vm0, %v243_v8 }
  0xd7   : > { %v276_v9 = vpop.trf.xlu1 }
  0xd8   : > { %309 = vst.msk [vmem:[%s1048_s15 + $0x88] sm:$0xff] %vm291_vm0, %v276_v9  ;;  %v244_v10 = vpop.trf.xlu0 }
  0xd9   : > { %293 = vst.msk [vmem:[%s1048_s15 + $0x8] sm:$0xff] %vm291_vm0, %v244_v10 }
  0xdb   : > { %v277_v11 = vpop.trf.xlu1 }
  0xdc   : > { %310 = vst.msk [vmem:[%s1048_s15 + $0x90] sm:$0xff] %vm291_vm0, %v277_v11  ;;  %v245_v12 = vpop.trf.xlu0 }
  0xdd   : > { %294 = vst.msk [vmem:[%s1048_s15 + $0x10] sm:$0xff] %vm291_vm0, %v245_v12 }
  0xdf   : > { %v278_v13 = vpop.trf.xlu1 }
  0xe0   : > { %311 = vst.msk [vmem:[%s1048_s15 + $0x98] sm:$0xff] %vm291_vm0, %v278_v13  ;;  %v246_v14 = vpop.trf.xlu0 }
  0xe1   : > { %295 = vst.msk [vmem:[%s1048_s15 + $0x18] sm:$0xff] %vm291_vm0, %v246_v14 }
  0xe3   : > { %v279_v15 = vpop.trf.xlu1 }
  0xe4   : > { %312 = vst.msk [vmem:[%s1048_s15 + $0xa0] sm:$0xff] %vm291_vm0, %v279_v15  ;;  %v247_v16 = vpop.trf.xlu0 }
  0xe5   : > { %296 = vst.msk [vmem:[%s1048_s15 + $0x20] sm:$0xff] %vm291_vm0, %v247_v16 }
  0xe7   : > { %v280_v17 = vpop.trf.xlu1 }
  0xe8   : > { %313 = vst.msk [vmem:[%s1048_s15 + $0xa8] sm:$0xff] %vm291_vm0, %v280_v17  ;;  %v248_v18 = vpop.trf.xlu0 }
  0xe9   : > { %297 = vst.msk [vmem:[%s1048_s15 + $0x28] sm:$0xff] %vm291_vm0, %v248_v18 }
  0xeb   : > { %v281_v19 = vpop.trf.xlu1 }
  0xec   : > { %314 = vst.msk [vmem:[%s1048_s15 + $0xb0] sm:$0xff] %vm291_vm0, %v281_v19  ;;  %v249_v20 = vpop.trf.xlu0 }
  0xed   : > { %298 = vst.msk [vmem:[%s1048_s15 + $0x30] sm:$0xff] %vm291_vm0, %v249_v20 }
  0xef   : > { %v282_v21 = vpop.trf.xlu1 }
  0xf0   : > { %315 = vst.msk [vmem:[%s1048_s15 + $0xb8] sm:$0xff] %vm291_vm0, %v282_v21  ;;  %v250_v22 = vpop.trf.xlu0 }
  0xf1   : > { %299 = vst.msk [vmem:[%s1048_s15 + $0x38] sm:$0xff] %vm291_vm0, %v250_v22 }
  0xf3   : > { %v283_v23 = vpop.trf.xlu1 }
  0xf4   : > { %316 = vst.msk [vmem:[%s1048_s15 + $0xc0] sm:$0xff] %vm291_vm0, %v283_v23  ;;  %v251_v24 = vpop.trf.xlu0 }
  0xf5   : > { %300 = vst.msk [vmem:[%s1048_s15 + $0x40] sm:$0xff] %vm291_vm0, %v251_v24 }
  0xf7   : > { %v284_v25 = vpop.trf.xlu1 }
  0xf8   : > { %317 = vst.msk [vmem:[%s1048_s15 + $0xc8] sm:$0xff] %vm291_vm0, %v284_v25  ;;  %v252_v26 = vpop.trf.xlu0 }
  0xf9   : > { %301 = vst.msk [vmem:[%s1048_s15 + $0x48] sm:$0xff] %vm291_vm0, %v252_v26 }
  0xfb   : > { %v285_v27 = vpop.trf.xlu1 }
  0xfc   : > { %318 = vst.msk [vmem:[%s1048_s15 + $0xd0] sm:$0xff] %vm291_vm0, %v285_v27  ;;  %v253_v28 = vpop.trf.xlu0 }
  0xfd   : > { %302 = vst.msk [vmem:[%s1048_s15 + $0x50] sm:$0xff] %vm291_vm0, %v253_v28 }
  0xff   : > { %v286_v29 = vpop.trf.xlu1 }
 0x100   : > { %319 = vst.msk [vmem:[%s1048_s15 + $0xd8] sm:$0xff] %vm291_vm0, %v286_v29  ;;  %v254_v30 = vpop.trf.xlu0 }
 0x101   : > { %303 = vst.msk [vmem:[%s1048_s15 + $0x58] sm:$0xff] %vm291_vm0, %v254_v30 }
 0x103   : > { %v287_v31 = vpop.trf.xlu1 }
 0x104   : > { %320 = vst.msk [vmem:[%s1048_s15 + $0xe0] sm:$0xff] %vm291_vm0, %v287_v31  ;;  %v255_v32 = vpop.trf.xlu0 }
 0x105   : > { %304 = vst.msk [vmem:[%s1048_s15 + $0x60] sm:$0xff] %vm291_vm0, %v255_v32 }
 0x107   : > { %v288_v33 = vpop.trf.xlu1 }
 0x108   : > { %321 = vst.msk [vmem:[%s1048_s15 + $0xe8] sm:$0xff] %vm291_vm0, %v288_v33  ;;  %v256_v34 = vpop.trf.xlu0 }
 0x109   : > { %305 = vst.msk [vmem:[%s1048_s15 + $0x68] sm:$0xff] %vm291_vm0, %v256_v34 }
 0x10b   : > { %v289_v35 = vpop.trf.xlu1 }
 0x10c   : > { %322 = vst.msk [vmem:[%s1048_s15 + $0xf0] sm:$0xff] %vm291_vm0, %v289_v35  ;;  %v257_v36 = vpop.trf.xlu0 }
 0x10d   : > { %306 = vst.msk [vmem:[%s1048_s15 + $0x70] sm:$0xff] %vm291_vm0, %v257_v36  ;;  %330 = sbr.rel (!%p1260_p7) target bundleno = 322 (0x142), region = 32 }
 0x10f   : > { %v290_v37 = vpop.trf.xlu1 }
 0x110   : > { %323 = vst.msk [vmem:[%s1048_s15 + $0xf8] sm:$0xff] %vm291_vm0, %v290_v37  ;;  %v258_v38 = vpop.trf.xlu0 }
 0x111   : > { %307 = vst.msk [vmem:[%s1048_s15 + $0x78] sm:$0xff] %vm291_vm0, %v258_v38 }
 0x112   : > { %s1273_s25 = smov (!%p333_p8, %s332_s25), 32 }
 0x113   : > { %s688_s29 = sshll.u32 %s1273_s25, 7 }
 0x114   : > { %p691_p11 = scmp.eq.s32.totalorder %s688_s29, 0 }
 0x115   : > { %s1127_s16 = sshrl.u32 (!%p691_p11), %s1273_s25, 5 }
 0x116   : > { %341 = sbr.rel (%p691_p11) target bundleno = 322 (0x142), region = 36  ;;  %p692_p3 = scmp.le.s32.totalorder (!%p691_p11), %s1127_s16, 0 }
 0x11b   : > { %628 = sbr.rel (%p692_p3) target bundleno = 305 (0x131), region = 118  ;;  %s1261_s10 = smov (!%p692_p3), %s1121_s28 }
 0x11c   : > { %s1262_s30 = smov (!%p692_p3), %s1048_s15  ;;  %s1136_s2 = smov (!%p692_p3), 0  }
 0x11d   : > { %s1138_s3 = smov (!%p692_p3), 0  }
 0x120 LB: >> { %v466_v39 = vld [vmem:[%s925_s30] sm:$0xff]  ;;  %v468_v40 = vld [vmem:[%s925_s30 + $0x8] sm:$0xff]  ;;  %v470_v41 = vld [vmem:[%s925_s30 + $0x10] sm:$0xff]  ;;  %s530_s4 = sadd.s32 1, %s929_s2  ;;  %s460_s3 = sadd.s32 1, %s933_s3   ;;  %s933_s3 = sphi %s1138_s3, %s460_s3   ;;  %s929_s2 = sphi %s1136_s2, %s1265_s2   ;;  %s925_s30 = sphi %s1262_s30, %s1264_s30   ;;  %s921_s10 = sphi %s1261_s10, %s1263_s10  }
 0x121   : >> { %467 = vst [vmem:[%s921_s10] sm:$0xff] %v466_v39  ;;  %469 = vst [vmem:[%s921_s10 + $0x8] sm:$0xff] %v468_v40  ;;  %v472_v42 = vld [vmem:[%s925_s30 + $0x18] sm:$0xff]  ;;  %v474_v43 = vld [vmem:[%s925_s30 + $0x20] sm:$0xff]  ;;  %p531_p4 = scmp.ge.s32.totalorder %s530_s4, %s1127_s16  ;;  %p459_p5 = scmp.ge.s32.totalorder %s460_s3, %s1127_s16 }
 0x122   : >> { %471 = vst [vmem:[%s921_s10 + $0x10] sm:$0xff] %v470_v41  ;;  %v476_v44 = vld [vmem:[%s925_s30 + $0x28] sm:$0xff]  ;;  %473 = vst [vmem:[%s921_s10 + $0x18] sm:$0xff] %v472_v42  ;;  %v478_v45 = vld [vmem:[%s925_s30 + $0x30] sm:$0xff] }
 0x123   : >> { %475 = vst [vmem:[%s921_s10 + $0x20] sm:$0xff] %v474_v43  ;;  %477 = vst [vmem:[%s921_s10 + $0x28] sm:$0xff] %v476_v44  ;;  %v480_v46 = vld [vmem:[%s925_s30 + $0x38] sm:$0xff]  ;;  %v482_v47 = vld [vmem:[%s925_s30 + $0x40] sm:$0xff]  ;;  %s1275_s4 = smov (%p531_p4, %s530_s4), 0 }
 0x124   : >> { %479 = vst [vmem:[%s921_s10 + $0x30] sm:$0xff] %v478_v45  ;;  %481 = vst [vmem:[%s921_s10 + $0x38] sm:$0xff] %v480_v46  ;;  %v484_v48 = vld [vmem:[%s925_s30 + $0x48] sm:$0xff]  ;;  %v486_v49 = vld [vmem:[%s925_s30 + $0x50] sm:$0xff]  ;;  %s693_s5 = sshll.u32 %s1275_s4, 8  ;;  %s1265_s2 = smov %s1275_s4 }
 0x125   : >> { %483 = vst [vmem:[%s921_s10 + $0x40] sm:$0xff] %v482_v47  ;;  %v488_v50 = vld [vmem:[%s925_s30 + $0x58] sm:$0xff]  ;;  %485 = vst [vmem:[%s921_s10 + $0x48] sm:$0xff] %v484_v48  ;;  %v490_v51 = vld [vmem:[%s925_s30 + $0x60] sm:$0xff]  ;;  %s1194_s6 = scalar_lea.vmem %s1048_s15, %s693_s5 [#allocation4]   ;;  %s536_s12 = scalar_lea.vmem %s1121_s28, %s693_s5  }
 0x126   : >> { %487 = vst [vmem:[%s921_s10 + $0x50] sm:$0xff] %v486_v49  ;;  %489 = vst [vmem:[%s921_s10 + $0x58] sm:$0xff] %v488_v50  ;;  %v492_v52 = vld [vmem:[%s925_s30 + $0x68] sm:$0xff]  ;;  %v494_v53 = vld [vmem:[%s925_s30 + $0x70] sm:$0xff] }
 0x127   : >> { %491 = vst [vmem:[%s921_s10 + $0x60] sm:$0xff] %v490_v51  ;;  %493 = vst [vmem:[%s921_s10 + $0x68] sm:$0xff] %v492_v52  ;;  %v496_v54 = vld [vmem:[%s925_s30 + $0x78] sm:$0xff]  ;;  %v498_v55 = vld [vmem:[%s925_s30 + $0x80] sm:$0xff] }
 0x128   : >> { %495 = vst [vmem:[%s921_s10 + $0x70] sm:$0xff] %v494_v53  ;;  %v500_v56 = vld [vmem:[%s925_s30 + $0x88] sm:$0xff]  ;;  %497 = vst [vmem:[%s921_s10 + $0x78] sm:$0xff] %v496_v54  ;;  %v502_v57 = vld [vmem:[%s925_s30 + $0x90] sm:$0xff] }
 0x129   : >> { %499 = vst [vmem:[%s921_s10 + $0x80] sm:$0xff] %v498_v55  ;;  %501 = vst [vmem:[%s921_s10 + $0x88] sm:$0xff] %v500_v56  ;;  %v504_v58 = vld [vmem:[%s925_s30 + $0x98] sm:$0xff]  ;;  %v506_v59 = vld [vmem:[%s925_s30 + $0xa0] sm:$0xff] }
 0x12a   : >> { %503 = vst [vmem:[%s921_s10 + $0x90] sm:$0xff] %v502_v57  ;;  %505 = vst [vmem:[%s921_s10 + $0x98] sm:$0xff] %v504_v58  ;;  %v508_v60 = vld [vmem:[%s925_s30 + $0xa8] sm:$0xff]  ;;  %v510_v61 = vld [vmem:[%s925_s30 + $0xb0] sm:$0xff] }
 0x12b   : >> { %507 = vst [vmem:[%s921_s10 + $0xa0] sm:$0xff] %v506_v59  ;;  %v512_v62 = vld [vmem:[%s925_s30 + $0xb8] sm:$0xff]  ;;  %509 = vst [vmem:[%s921_s10 + $0xa8] sm:$0xff] %v508_v60  ;;  %v514_v63 = vld [vmem:[%s925_s30 + $0xc0] sm:$0xff] }
 0x12c   : >> { %511 = vst [vmem:[%s921_s10 + $0xb0] sm:$0xff] %v510_v61  ;;  %513 = vst [vmem:[%s921_s10 + $0xb8] sm:$0xff] %v512_v62  ;;  %v516_v0 = vld [vmem:[%s925_s30 + $0xc8] sm:$0xff]  ;;  %v518_v1 = vld [vmem:[%s925_s30 + $0xd0] sm:$0xff]  ;;  %462 = sbr.rel (!%p459_p5) target bundleno = 288 (0x120), region = 124 }
 0x12d   : >> { %515 = vst [vmem:[%s921_s10 + $0xc0] sm:$0xff] %v514_v63  ;;  %517 = vst [vmem:[%s921_s10 + $0xc8] sm:$0xff] %v516_v0  ;;  %v520_v2 = vld [vmem:[%s925_s30 + $0xd8] sm:$0xff]  ;;  %v522_v3 = vld [vmem:[%s925_s30 + $0xe0] sm:$0xff] }
 0x12e   : >> { %519 = vst [vmem:[%s921_s10 + $0xd0] sm:$0xff] %v518_v1  ;;  %v524_v4 = vld [vmem:[%s925_s30 + $0xe8] sm:$0xff]  ;;  %521 = vst [vmem:[%s921_s10 + $0xd8] sm:$0xff] %v520_v2  ;;  %v526_v5 = vld [vmem:[%s925_s30 + $0xf0] sm:$0xff] }
 0x12f   : >> { %523 = vst [vmem:[%s921_s10 + $0xe0] sm:$0xff] %v522_v3  ;;  %525 = vst [vmem:[%s921_s10 + $0xe8] sm:$0xff] %v524_v4  ;;  %v528_v6 = vld [vmem:[%s925_s30 + $0xf8] sm:$0xff]  ;;  %s1264_s30 = smov %s1194_s6 }
 0x130   : >> { %527 = vst [vmem:[%s921_s10 + $0xf0] sm:$0xff] %v526_v5  ;;  %529 = vst [vmem:[%s921_s10 + $0xf8] sm:$0xff] %v528_v6  ;;  %s1263_s10 = smov %s536_s12 }
 0x131 PF: > { %s1235_s13 = sand.u32 31, %s1273_s25   ;;  %s705_s17 = sshll.u32 %s1127_s16, 8 }
 0x132   : > { %s541_s18 = scalar_lea.vmem %s1048_s15, %s705_s17 [#allocation4]   ;;  %s543_s19 = scalar_lea.vmem %s1121_s28, %s705_s17  }
 0x133   : > { %p698_p6 = scmp.le.s32.totalorder %s1235_s13, 0 }
 0x134   : > { %s935_s20 = smov (!%p698_p6), %s543_s19   ;;  %s939_s22 = smov (!%p698_p6), %s541_s18  }
 0x135   : > { %642 = sbr.rel (%p698_p6) target bundleno = 322 (0x142), region = 129  ;;  %s943_s24 = smov (!%p698_p6), 0  }
 0x136   : > { %s947_s9 = smov (!%p698_p6), 0  }
 0x13a LB: >> { %v553_v7 = vld [vmem:[%s941_s22] sm:$0xff]  ;;  %s555_s21 = sadd.s32 1, %s945_s24  ;;  %s547_s9 = sadd.s32 1, %s949_s9   ;;  %s949_s9 = sphi %s947_s9, %s547_s9   ;;  %s945_s24 = sphi %s943_s24, %s944_s24   ;;  %s941_s22 = sphi %s939_s22, %s560_s22   ;;  %s937_s20 = sphi %s935_s20, %s561_s20  }
 0x13b   : >> { %554 = vst [vmem:[%s937_s20] sm:$0xff] %v553_v7  ;;  %p556_p9 = scmp.ge.s32.totalorder %s555_s21, %s1235_s13  ;;  %p546_p10 = scmp.ge.s32.totalorder %s547_s9, %s1235_s13 }
 0x13d   : >> { %s1277_s21 = smov (%p556_p9, %s555_s21), 0  ;;  %549 = sbr.rel (!%p546_p10) target bundleno = 314 (0x13a), region = 135 }
 0x13e   : >> { %s699_s15 = sshll.u32 %s1277_s21, 3  ;;  %s944_s24 = smov %s1277_s21  }
 0x13f   : >> { %s560_s22 = scalar_lea.vmem %s541_s18, %s699_s15 [#allocation4]   ;;  %s561_s20 = scalar_lea.vmem %s543_s19, %s699_s15  }
 0x142 PF: > { %p11_p12 = scmp.ge.s32.totalorder %s984_s11, 4   ;;  %s1266_s6 = smov %s909_s7 }
 0x143   : > { %s1267_s7 = smov %s913_s8  ;;  %s1268_s8 = smov %s994_s14 }
 0x144   : > { %s1269_s9 = smov %s984_s11  ;;  %13 = sbr.rel (!%p11_p12) target bundleno = 3 (0x3), region = 146 }
 0x149   :  { %577 = vsyncpa [#allocation3], 1 }
 0x14a   :  { %579 = vsyncpa [#allocation3 + $0x1], 1 }

// kernel: tpu_custom_call.1
= control target key start
LH: loop header
LB: loop body
LE: loop exit
PB: predicated region body
PF: predicated region fallthrough
CT: control target
= control target key end

     0   :  { %6 = vsyncpa [#allocation3], 0  ;;  %s699_s0 = inlined_call_operand.hbm [shape: f32[1,300], index: 0, kind: input, shape index: {}]   ;;  %s700_s1 = inlined_call_operand.hbm [shape: f32[40,300], index: 1, kind: output, shape index: {}]  }
   0x1   :  { %8 = vsyncpa [#allocation3 + $0x1], 0 }
   0x2   :  { %9 = vsyncpa [#allocation4], 0 }
   0x3   :  { %11 = vsyncpa [#allocation4 + $0x1], 0  ;;  %s523_s6 = smov 0   ;;  %s525_s7 = smov 0  }
   0x4   :  { %s527_s8 = smov 0   ;;  %s529_s9 = smov 0  }
   0x5 LB: > { %s544_s10 = sadd.s32 4294967295, %s507_s9   ;;  %s335_s11 = sadd.s32 4294967294, %s507_s9   ;;  %s507_s9 = sphi %s529_s9, %s711_s9   ;;  %s503_s8 = sphi %s527_s8, %s710_s8   ;;  %s499_s7 = sphi %s525_s7, %s709_s7   ;;  %s495_s6 = sphi %s523_s6, %s708_s6  }
   0x6   : > { %s548_s12 = sadd.s32 1, %s507_s9   ;;  %s24_s13 = sadd.s32 1, %s503_s8 }
   0x7   : > { %s21_s14 = ssub.s32 %s507_s9, %s548_s12  ;;  %p31_p0 = scmp.ne.s32.totalorder %s503_s8, %s499_s7 }
   0x8   : > { %p22_p1 = scmp.eq.s32.totalorder %s21_s14, 0  ;;  %p32_p2 = scmp.eq.s32.totalorder %s507_s9, 0 }
   0x9   : > { %p37_p3 = scmp.ne.s32.totalorder %s499_s7, %s495_s6  ;;  %p38_p4 = scmp.eq.s32.totalorder %s544_s10, 0 }
   0xa   : > { %s560_s15 = scalar_select %p22_p1, %s503_s8, %s24_s13  }
   0xb   : > { %p33_p5 = por %p32_p2, %p31_p0  ;;  %p562_p6 = por %p38_p4, %p37_p3 }
   0xc   : > { %p61_p7 = scmp.eq.s32.totalorder %s544_s10, 1  ;;  %p67_p8 = scmp.eq.s32.totalorder %s335_s11, 1 }
   0xd   : > { %p701_p11 = scmp.ge.s32.totalorder %s507_s9, 2 }
   0xe   : > { %p567_p9 = por %p61_p7, %p31_p0  ;;  %p571_p10 = por %p67_p8, %p37_p3 }
   0xf   : > { %83 = sbr.rel (%p701_p11) target bundleno = 51 (0x33), region = 16 }
  0x10   : > { %s703_s17 = scalar_select %p567_p9, 1, 0 }
  0x11   : > { %s704_s18 = scalar_select %p571_p10, 1, 0 }
  0x14   : > { %86 = sbr.rel (!%p33_p5) target bundleno = 51 (0x33), region = 20  ;;  %s87_s19 = sand.u32 (%p33_p5), 1, %s503_s8  }
  0x15   : > { %s339_s20 = sshll.u32 (%p33_p5), %s507_s9, 1  ;;  %s338_s21 = sshll.u32 (%p33_p5), %s87_s19, 1 }
  0x16   : > { %s93_s22 = ssub.s32 (%p33_p5), 3, %s339_s20  ;;  %s583_s25 = scalar_lea.sflag (%p33_p5), [#allocation3], %s87_s19 }
  0x17   : > { %p94_p12 = scmp.lt.s32.totalorder (%p33_p5), %s93_s22, 2  ;;  %s91_s26 = scalar_lea.vmem (%p33_p5), [#allocation2], %s338_s21 }
  0x19   : > { %s713_s22 = smov (!%p94_p12, %s93_s22), 2 }
  0x1a   : > { %s580_s23 = sshll.u32 %s713_s22, 4 }
  0x1b   : > { %s98_s24 = ssub.s32 32, %s580_s23 }
  0x1c   : > { %99 = vsyncadd %s583_s25, %s98_s24  ;;  %p341_p13 = scmp.ne.s32.totalorder %s580_s23, 0  ;;  %s353_s27 = sshll.u32 %s507_s9, 5 }
  0x1d   : > { %s102_s30 = scalar_lea.hbm %s699_s0, %s353_s27  ;;  %s104_s2 = sshll.u32 %s91_s26, 4  ;;  %s105_s2 = int_to_ptr.vmem [resolvable:$true] %s104_s2 }
  0x1e   : > { %s417_s3 = scalar_lea.hbm %s102_s30, %s580_s23  ;;  %s421_s11 = scalar_lea.hbm %s699_s0, 48 }
  0x1f   : > { %p418_p0 = scmp.ne.s32.totalorder %s102_s30, %s417_s3  ;;  %p422_p3 = scmp.lt.s32.totalorder %s102_s30, %s699_s0 }
  0x20   : > { %p423_p4 = scmp.lt.s32.totalorder %s421_s11, %s417_s3 }
  0x21   : > { %p419_p1 = pnand %p418_p0, %p341_p13 }
  0x22   : > { %p424_p5 = por %p423_p4, %p422_p3 }
  0x23   : > { %p420_p2 = pneg %p419_p1 }
  0x25   : > { %p425_p7 = pnand %p424_p5, %p420_p2 }
  0x27   : > { %428 = shalt.err (!%p425_p7)
}
  0x28   : > { %s429_s19 = scalar_lea.vmem %s105_s2, %s580_s23  ;;  %s509_s20 = smov [#allocation2]  }
  0x29   : > { %p430_p8 = scmp.ne.s32.totalorder %s105_s2, %s429_s19  ;;  %s433_s21 = sshll.u32 %s509_s20, 4  ;;  %s434_s21 = int_to_ptr.vmem [resolvable:$false] %s433_s21 }
  0x2a   : > { %s435_s22 = scalar_lea.vmem %s434_s21, 64  ;;  %p436_p1 = scmp.lt.s32.totalorder %s105_s2, %s434_s21 }
  0x2b   : > { %p431_p12 = pnand %p430_p8, %p341_p13  ;;  %p437_p11 = scmp.lt.s32.totalorder %s435_s22, %s429_s19 }
  0x2d   : > { %p432_p0 = pneg %p431_p12  ;;  %p438_p10 = por %p437_p11, %p436_p1 }
  0x2f   : > { %p439_p9 = pnand %p438_p10, %p432_p0 }
  0x31   : > { %442 = shalt.err (!%p439_p9)
}
  0x32   : > { %107 = dma.hbm_to_vmem [thread:$0]  (%p341_p13), %s102_s30, %s580_s23, %s105_s2, %s583_s25  }
  0x33 PF: > { %p343_p2 = scmp.ge.s32.totalorder %s507_s9, 1  ;;  %p109_p3 = scmp.lt.s32.totalorder %s507_s9, 3 }
  0x35   : > { %p110_p4 = pnand %p343_p2, %p109_p3 }
  0x36   : > { %s610_s24 = sand.u32 (!%p110_p4), 1, %s499_s7  }
  0x37   : > { %113 = sbr.rel (%p110_p4) target bundleno = 131 (0x83), region = 24  ;;  %s344_s26 = sshll.u32 (!%p110_p4), %s610_s24, 1 }
  0x38   : > { %s116_s27 = scalar_lea.sflag (!%p110_p4), [#allocation3], %s610_s24  ;;  %s119_s28 = scalar_lea.vmem (!%p110_p4), [#allocation2], %s344_s26 }
  0x3c   : > { %486 = dma.done.wait (%p562_p6), %s116_s27, 32  }
  0x3d   : > { %488 = vsyncadd (%p562_p6), %s116_s27, 4294967264  ;;  %v149_v0 = vlaneseq  ;;  %v148_v11 = vld [vmem:[%s119_s28] sm:$0x3]  ;;  %s355_s16 = smul.u32 80, %s610_s24  ;;  %s242_s25 = scalar_lea.sflag [#allocation4], %s610_s24 }
  0x3e   : > { %p705_p6 = scmp.ne.s32.totalorder %s703_s17, 0 }
  0x3f   : > { %v150_v1 = vshrl.u32 %v149_v0, 7  ;;  %s619_s23 = scalar_lea.vmem [#allocation5], %s355_s16  ;;  %s345_s29 = sshll.u32 (%p705_p6), %s544_s10, 1 }
  0x40   : > { %s250_s30 = ssub.s32 (%p705_p6), 3, %s345_s29 }
  0x41   : > { %v155_v2 = vcvt.s32.f32 %v150_v1  ;;  %v173_v3 = vsub.s32 0, %v150_v1  ;;  %v177_v4 = vsub.s32 1, %v150_v1  ;;  %v151_v5 = vadd.s32 8, %v150_v1  ;;  %p251_p9 = scmp.lt.s32.totalorder (%p705_p6), %s250_s30, 2 }
  0x42   : > { %v152_v6 = vadd.s32 16, %v150_v1  ;;  %v153_v7 = vadd.s32 24, %v150_v1  ;;  %v154_v8 = vadd.s32 32, %v150_v1 }
  0x43   : > { %v160_v9 = vmul.f32 0.20512821, %v155_v2  ;;  %v156_v10 = vcvt.s32.f32 %v151_v5  ;;  %v174_v15 = vrot.slane %v148_v11, %v173_v3  ;;  %v178_v16 = vrot.slane %v148_v11, %v177_v4 }
  0x44   : > { %v157_v12 = vcvt.s32.f32 %v152_v6  ;;  %v158_v13 = vcvt.s32.f32 %v153_v7  ;;  %v159_v14 = vcvt.s32.f32 %v154_v8 }
  0x45   : > { %v161_v17 = vmul.f32 0.20512821, %v156_v10  ;;  %v181_v21 = vsub.f32 %v174_v15, %v160_v9  ;;  %v182_v22 = vsub.f32 %v178_v16, %v160_v9 }
  0x46   : > { %v162_v18 = vmul.f32 0.20512821, %v157_v12  ;;  %v163_v19 = vmul.f32 0.20512821, %v158_v13  ;;  %v164_v20 = vmul.f32 0.20512821, %v159_v14 }
  0x47   : > { %v183_v23 = vsub.f32 %v174_v15, %v161_v17  ;;  %v184_v24 = vsub.f32 %v178_v16, %v161_v17  ;;  %v191_v29 = vmul.f32 %v181_v21, %v181_v21  ;;  %v192_v30 = vmul.f32 %v182_v22, %v182_v22 }
  0x48   : > { %v185_v25 = vsub.f32 %v174_v15, %v162_v18  ;;  %v186_v26 = vsub.f32 %v178_v16, %v162_v18  ;;  %v187_v27 = vsub.f32 %v174_v15, %v163_v19  ;;  %v188_v28 = vsub.f32 %v178_v16, %v163_v19 }
  0x49   : > { %v193_v31 = vmul.f32 %v183_v23, %v183_v23  ;;  %v194_v32 = vmul.f32 %v184_v24, %v184_v24  ;;  %v201_v37 = vmul.f32 -4.875, %v191_v29  ;;  %v202_v38 = vmul.f32 -4.875, %v192_v30 }
  0x4a   : > { %v195_v33 = vmul.f32 %v185_v25, %v185_v25  ;;  %v196_v34 = vmul.f32 %v186_v26, %v186_v26  ;;  %v197_v35 = vmul.f32 %v187_v27, %v187_v27  ;;  %v198_v36 = vmul.f32 %v188_v28, %v188_v28 }
  0x4b   : > { %v203_v39 = vmul.f32 -4.875, %v193_v31  ;;  %v204_v40 = vmul.f32 -4.875, %v194_v32  ;;  %v211_v44 = vmul.f32 1.442695, %v201_v37  ;;  %v213_v45 = vmul.f32 1.442695, %v202_v38 }
  0x4c   : > { %v205_v41 = vmul.f32 -4.875, %v195_v33  ;;  %v206_v42 = vmul.f32 -4.875, %v196_v34  ;;  %v207_v43 = vmul.f32 -4.875, %v197_v35  ;;  %v189_v47 = vsub.f32 %v174_v15, %v164_v20 }
  0x4d   : > { %v215_v46 = vmul.f32 1.442695, %v203_v39  ;;  %v217_v48 = vmul.f32 1.442695, %v204_v40  ;;  %v208_v49 = vmul.f32 -4.875, %v198_v36  ;;  %v190_v50 = vsub.f32 %v178_v16, %v164_v20 }
  0x4e   : > { %397 = vpow2.f32 %v211_v44  ;;  %v219_v51 = vmul.f32 1.442695, %v205_v41  ;;  %v199_v52 = vmul.f32 %v189_v47, %v189_v47  ;;  %v221_v53 = vmul.f32 1.442695, %v206_v42 }
  0x4f   : > { %399 = vpow2.f32 %v213_v45  ;;  %v200_v54 = vmul.f32 %v190_v50, %v190_v50  ;;  %v223_v55 = vmul.f32 1.442695, %v207_v43  ;;  %v225_v57 = vmul.f32 1.442695, %v208_v49 }
  0x50   : > { %401 = vpow2.f32 %v215_v46  ;;  %v209_v56 = vmul.f32 -4.875, %v199_v52 }
  0x51   : > { %403 = vpow2.f32 %v217_v48  ;;  %v210_v58 = vmul.f32 -4.875, %v200_v54 }
  0x52   : > { %405 = vpow2.f32 %v219_v51  ;;  %v227_v59 = vmul.f32 1.442695, %v209_v56 }
  0x53   : > { %407 = vpow2.f32 %v221_v53  ;;  %v229_v60 = vmul.f32 1.442695, %v210_v58 }
  0x54   : > { %409 = vpow2.f32 %v223_v55 }
  0x55   : > { %411 = vpow2.f32 %v225_v57 }
  0x56   : > { %413 = vpow2.f32 %v227_v59 }
  0x57   : > { %415 = vpow2.f32 %v229_v60 }
  0x5b   : > { %v398_v61 = vpop.eup %397 }
  0x5c   : > { %v400_v62 = vpop.eup %399  ;;  %231 = vst [vmem:[%s619_s23] sm:$0xff] %v398_v61 }
  0x5d   : > { %v402_v63 = vpop.eup %401  ;;  %232 = vst [vmem:[%s619_s23 + $0x8] sm:$0xff] %v400_v62 }
  0x5e   : > { %v404_v0 = vpop.eup %403  ;;  %233 = vst [vmem:[%s619_s23 + $0x10] sm:$0xff] %v402_v63 }
  0x5f   : > { %v406_v1 = vpop.eup %405  ;;  %234 = vst [vmem:[%s619_s23 + $0x18] sm:$0xff] %v404_v0 }
  0x60   : > { %v408_v2 = vpop.eup %407  ;;  %235 = vst [vmem:[%s619_s23 + $0x20] sm:$0xff] %v406_v1 }
  0x61   : > { %v410_v3 = vpop.eup %409  ;;  %236 = vst [vmem:[%s619_s23 + $0x28] sm:$0xff] %v408_v2  ;;  %248 = sbr.rel (!%p705_p6) target bundleno = 131 (0x83), region = 32 }
  0x62   : > { %v412_v4 = vpop.eup %411  ;;  %237 = vst [vmem:[%s619_s23 + $0x30] sm:$0xff] %v410_v3 }
  0x63   : > { %v414_v5 = vpop.eup %413  ;;  %238 = vst [vmem:[%s619_s23 + $0x38] sm:$0xff] %v412_v4 }
  0x64   : > { %v416_v6 = vpop.eup %415  ;;  %239 = vst [vmem:[%s619_s23 + $0x40] sm:$0xff] %v414_v5 }
  0x65   : > { %240 = vst [vmem:[%s619_s23 + $0x48] sm:$0xff] %v416_v6 }
  0x66   : > { %s715_s30 = smov (!%p251_p9, %s250_s30), 2 }
  0x67   : > { %s638_s2 = smul.u32 640, %s715_s30 }
  0x69   : > { %s255_s3 = ssub.s32 1280, %s638_s2 }
  0x6a   : > { %256 = vsyncadd %s242_s25, %s255_s3  ;;  %p346_p10 = scmp.ne.s32.totalorder %s638_s2, 0  ;;  %s354_s17 = sshll.u32 %s544_s10, 8 }
  0x6b   : > { %s648_s11 = scalar_lea.hbm %s700_s1, %s354_s17  ;;  %s348_s13 = sshll.u32 %s715_s30, 3 }
  0x6c   : > { %s262_s14 = sshll.u32 %s619_s23, 4  ;;  %s510_s20 = smov [#allocation5]   ;;  %s652_s14 = int_to_ptr.vmem [resolvable:$true] %s262_s14 }
  0x6d   : > { %s443_s19 = scalar_lea.vmem %s652_s14, %s638_s2  ;;  %s447_s21 = sshll.u32 %s510_s20, 4  ;;  %s448_s21 = int_to_ptr.vmem [resolvable:$false] %s447_s21 }
  0x6e   : > { %p444_p11 = scmp.ne.s32.totalorder %s652_s14, %s443_s19  ;;  %s449_s10 = scalar_lea.vmem %s448_s21, 2560 }
  0x6f   : > { %p450_p7 = scmp.lt.s32.totalorder %s652_s14, %s448_s21  ;;  %p451_p8 = scmp.lt.s32.totalorder %s449_s10, %s443_s19 }
  0x70   : > { %p445_p13 = pnand %p444_p11, %p346_p10 }
  0x71   : > { %p452_p12 = por %p451_p8, %p450_p7 }
  0x72   : > { %p446_p5 = pneg %p445_p13 }
  0x74   : > { %p453_p0 = pnand %p452_p12, %p446_p5 }
  0x76   : > { %456 = shalt.err (!%p453_p0)
}
  0x77   : > { %s457_s22 = scalar_lea.hbm %s648_s11, %s638_s2  ;;  %s461_s28 = scalar_lea.hbm %s700_s1, 1920 }
  0x78   : > { %p458_p1 = scmp.ne.s32.totalorder %s648_s11, %s457_s22  ;;  %p462_p4 = scmp.lt.s32.totalorder %s648_s11, %s700_s1 }
  0x79   : > { %p463_p6 = scmp.lt.s32.totalorder %s461_s28, %s457_s22 }
  0x7a   : > { %p459_p2 = pnand %p458_p1, %p346_p10 }
  0x7b   : > { %p464_p9 = por %p463_p6, %p462_p4 }
  0x7c   : > { %p460_p3 = pneg %p459_p2 }
  0x7e   : > { %p465_p11 = pnand %p464_p9, %p460_p3 }
  0x80   : > { %468 = shalt.err (!%p465_p11)
}
  0x81   : > { %s511_s29 = smov 256   ;;  %s512_s3 = smov 384  }
  0x82   : > { %268 = dma.vmem_to_hbm [thread:$0]  (%p346_p10), %s652_s14, %s638_s2, %s648_s11, %s242_s25, %s511_s29, %s512_s3, %s348_s13  }
  0x83 PF: > { %s277_s17 = sand.u32 1, %s495_s6   ;;  %p706_p13 = scmp.ne.s32.totalorder %s704_s18, 0 }
  0x84   : > { %p707_p5 = scmp.ge.s32.totalorder %s507_s9, 2  ;;  %s278_s4 = scalar_lea.sflag [#allocation4], %s277_s17 }
  0x86   : > { %p359_p7 = pnand %p707_p5, %p706_p13 }
  0x88   : > { %p360_p8 = pneg %p359_p7 }
  0x8a   : > { %490 = dma.done.wait (%p360_p8), %s278_s4, 1280  }
  0x8b   : > { %492 = vsyncadd (%p360_p8), %s278_s4, 4294966016  ;;  %p14_p12 = scmp.ge.s32.totalorder %s548_s12, 4   ;;  %s708_s6 = smov %s499_s7 }
  0x8c   : > { %s709_s7 = smov %s503_s8  ;;  %s710_s8 = smov %s560_s15 }
  0x8d   : > { %s711_s9 = smov %s548_s12  ;;  %16 = sbr.rel (!%p14_p12) target bundleno = 5 (0x5), region = 69 }
  0x92   :  { %283 = vsyncpa [#allocation3], 1 }
  0x93   :  { %285 = vsyncpa [#allocation3 + $0x1], 1 }
  0x94   :  { %286 = vsyncpa [#allocation4], 1 }
  0x95   :  { %288 = vsyncpa [#allocation4 + $0x1], 1 }

</bundles_post_ra>
